<compile_context>
chip_gen: v5e
topology: v5e:2x2
jax: 0.10.0
libtpu: 0.0.40
codegen_flags: <defaults>
</compile_context>

<pallas_src>
import functools

import jax
import jax.numpy as jnp
from jax.experimental import pallas as pl
from jax.experimental.pallas import tpu as pltpu

HIDDEN = 768
NUM_CLASSES = 2


def _round_up(x, m):
    return ((x + m - 1) // m) * m


def classifier_kernel(x_ref, w_ref, b_ref, o_ref, *, matmul_dtype):
    # Cast to the matmul dtype in-kernel (no extra HBM pass; hidden under DMA).
    x = x_ref[...].astype(matmul_dtype)
    w = w_ref[...].astype(matmul_dtype)
    # Linear: (TB, 768) @ (768, 2) -> (TB, 2), f32 accumulation on the MXU.
    logits = jnp.dot(x, w, preferred_element_type=jnp.float32) + b_ref[...]
    # Numerically-stable softmax over dim=1 (only the 2 real classes exist).
    m = jnp.max(logits, axis=1, keepdims=True)
    e = jnp.exp(logits - m)
    denom = jnp.sum(e, axis=1, keepdims=True)
    # Divide -> EUP reciprocal (free slot on this HBM-bound kernel).
    o_ref[...] = (e * pl.reciprocal(denom, approx=True)).astype(o_ref.dtype)


def classifier_forward(bert_rep_batch, weight, bias, *, block_rows=None,
                       matmul_dtype=jnp.bfloat16):
    """bert_rep_batch: (B, 768) f32; weight: (768, 2); bias: (2,) -> (B, 2) f32 probs."""
    B, H = bert_rep_batch.shape
    assert H == HIDDEN
    assert weight.shape == (HIDDEN, NUM_CLASSES)
    assert bias.shape == (NUM_CLASSES,)

    try:
        kind = jax.devices()[0].device_kind.lower()
    except Exception:  # pragma: no cover - defensive only
        kind = ""

    # Large batch tiles amortize per-grid-step overhead; chip-dependent target.
    if block_rows is None:
        block_rows = 2048 if "v5" in kind else 4096

    tb = min(block_rows, _round_up(B, 8))
    # v7x: 2 TensorCores share HBM -- keep at least 2 tiles on the parallel axis.
    if "v7" in kind and B > 8:
        tb = min(tb, _round_up(pl.cdiv(B, 2), 8))
    tb = max(8, _round_up(tb, 8))
    num_tiles = pl.cdiv(B, tb)

    x_itemsize = bert_rep_batch.dtype.itemsize
    # Double-buffered x tiles + output tiles + resident weight/bias + headroom.
    vmem_bytes = (2 * tb * HIDDEN * x_itemsize
                  + 2 * tb * NUM_CLASSES * 4
                  + HIDDEN * NUM_CLASSES * weight.dtype.itemsize
                  + (2 << 20))
    vmem_limit = int(min(max(vmem_bytes, 16 << 20), 64 << 20))

    bytes_accessed = (B * HIDDEN * x_itemsize
                      + HIDDEN * NUM_CLASSES * weight.dtype.itemsize
                      + NUM_CLASSES * 4
                      + B * NUM_CLASSES * 4)

    bias2d = bias.reshape(1, NUM_CLASSES).astype(jnp.float32)

    return pl.pallas_call(
        functools.partial(classifier_kernel, matmul_dtype=matmul_dtype),
        out_shape=jax.ShapeDtypeStruct((B, NUM_CLASSES), jnp.float32),
        grid=(num_tiles,),
        in_specs=[
            pl.BlockSpec((tb, HIDDEN), lambda i: (i, 0)),            # streamed per tile
            pl.BlockSpec((HIDDEN, NUM_CLASSES), lambda i: (0, 0)),   # VMEM-resident
            pl.BlockSpec((1, NUM_CLASSES), lambda i: (0, 0)),        # VMEM-resident
        ],
        out_specs=pl.BlockSpec((tb, NUM_CLASSES), lambda i: (i, 0)),
        compiler_params=pltpu.CompilerParams(
            dimension_semantics=("parallel",),
            vmem_limit_bytes=vmem_limit),
        cost_estimate=pl.CostEstimate(
            flops=2 * B * HIDDEN * NUM_CLASSES,
            transcendentals=B * NUM_CLASSES,
            bytes_accessed=bytes_accessed),
    )(bert_rep_batch, weight, bias2d)


if __name__ == "__main__":
    key = jax.random.PRNGKey(0)
    k_x, k_w, k_b = jax.random.split(key, 3)

    # Small batch of sentence pairs; deliberately NOT a multiple of 8 so the
    # ragged last block / masked output store path is exercised.
    B = 10
    # Stand-in for the pooled BERT representation of each sentence pair.
    bert_rep_batch = jax.random.normal(k_x, (B, HIDDEN), dtype=jnp.float32)

    # Deterministic nn.Linear(768, 2) init: U(-1/sqrt(768), 1/sqrt(768)).
    bound = 1.0 / (HIDDEN ** 0.5)
    weight = jax.random.uniform(k_w, (HIDDEN, NUM_CLASSES), jnp.float32,
                                minval=-bound, maxval=bound)
    bias = jax.random.uniform(k_b, (NUM_CLASSES,), jnp.float32,
                              minval=-bound, maxval=bound)

    probs = classifier_forward(bert_rep_batch, weight, bias)
    jax.block_until_ready(probs)

    # Reference with matching bf16 matmul inputs / f32 accumulation (tight check;
    # small slack for the approx EUP reciprocal in the kernel epilogue).
    x_bf = bert_rep_batch.astype(jnp.bfloat16)
    w_bf = weight.astype(jnp.bfloat16)
    ref_bf16 = jax.nn.softmax(
        jnp.dot(x_bf, w_bf, preferred_element_type=jnp.float32) + bias, axis=1)
    # Full-f32 reference (semantic check; looser tolerance due to bf16 matmul).
    ref_f32 = jax.nn.softmax(bert_rep_batch @ weight + bias, axis=1)

    assert probs.shape == (B, NUM_CLASSES)
    assert jnp.allclose(probs, ref_bf16, atol=5e-3, rtol=5e-3)
    assert jnp.allclose(probs, ref_f32, atol=2e-2, rtol=2e-2)
    assert jnp.allclose(jnp.sum(probs, axis=1), 1.0, atol=5e-3)

    print("KERNEL_OK")
</pallas_src>

<mosaic_0001>
module attributes {stable_mosaic.version = 11 : i64} {
  func.func @classifier_kernel(%arg0: i32, %arg1: memref<16x768xf32, #tpu.memory_space<vmem>>, %arg2: memref<768x2xf32, #tpu.memory_space<vmem>>, %arg3: memref<1x2xf32, #tpu.memory_space<vmem>>, %arg4: memref<16x2xf32, #tpu.memory_space<vmem>>) attributes {dimension_semantics = [#tpu.dimension_semantics<parallel>], iteration_bounds = array<i64: 1>, scalar_prefetch = 0 : i64, scratch_operands = 0 : i64, tpu.core_type = #tpu.core_type<tc>, window_params = [{transform_indices = @transform_0, window_bounds = array<i64: 16, 768>}, {pipeline_mode = #tpu.pipeline_mode<synchronous>, transform_indices = @transform_1, window_bounds = array<i64: 768, 2>}, {pipeline_mode = #tpu.pipeline_mode<synchronous>, transform_indices = @transform_2, window_bounds = array<i64: 1, 2>}, {transform_indices = @transform_3, window_bounds = array<i64: 16, 2>}]} {
    %c0 = arith.constant 0 : index
    %c0_0 = arith.constant 0 : index
    %0 = vector.load %arg1[%c0, %c0_0] : memref<16x768xf32, #tpu.memory_space<vmem>>, vector<16x768xf32>
    %1 = arith.truncf %0 : vector<16x768xf32> to vector<16x768xbf16>
    %c0_1 = arith.constant 0 : index
    %c0_2 = arith.constant 0 : index
    %2 = vector.load %arg2[%c0_1, %c0_2] : memref<768x2xf32, #tpu.memory_space<vmem>>, vector<768x2xf32>
    %3 = arith.truncf %2 : vector<768x2xf32> to vector<768x2xbf16>
    %cst = arith.constant dense<0.000000e+00> : vector<16x2xf32>
    %4 = tpu.matmul %1, %3, %cst {dimension_numbers = #tpu.dot_dimension_numbers<[1], [0], [0], [1], [0, 0, 1, 1], [], []>} : vector<16x768xbf16>, vector<768x2xbf16>, vector<16x2xf32> -> vector<16x2xf32>
    %c0_3 = arith.constant 0 : index
    %c0_4 = arith.constant 0 : index
    %5 = vector.load %arg3[%c0_3, %c0_4] : memref<1x2xf32, #tpu.memory_space<vmem>>, vector<1x2xf32>
    %6 = vector.broadcast %5 : vector<1x2xf32> to vector<16x2xf32>
    %7 = arith.addf %4, %6 : vector<16x2xf32>
    %cst_5 = arith.constant dense<0xFF800000> : vector<16xf32>
    %8 = vector.multi_reduction <maximumf>, %7, %cst_5 [1] : vector<16x2xf32> to vector<16xf32>
    %9 = vector.shape_cast %8 : vector<16xf32> to vector<16x1xf32>
    %10 = vector.broadcast %9 : vector<16x1xf32> to vector<16x2xf32>
    %11 = arith.subf %7, %10 : vector<16x2xf32>
    %12 = math.exp %11 : vector<16x2xf32>
    %cst_6 = arith.constant dense<0.000000e+00> : vector<16xf32>
    %13 = vector.multi_reduction <add>, %12, %cst_6 [1] : vector<16x2xf32> to vector<16xf32>
    %14 = vector.shape_cast %13 : vector<16xf32> to vector<16x1xf32>
    %15 = tpu.reciprocal %14 {approx = true} : vector<16x1xf32> -> vector<16x1xf32>
    %16 = vector.broadcast %15 : vector<16x1xf32> to vector<16x2xf32>
    %17 = arith.mulf %12, %16 : vector<16x2xf32>
    %c0_7 = arith.constant 0 : index
    %c0_8 = arith.constant 0 : index
    %18 = vector.load %arg4[%c0_7, %c0_8] : memref<16x2xf32, #tpu.memory_space<vmem>>, vector<16x2xf32>
    tpu.vector_store %arg4[%c0_7, %c0_8], %17 {strides = array<i32>} : memref<16x2xf32, #tpu.memory_space<vmem>>, vector<16x2xf32>,
    return
  }
  func.func @transform_0(%arg0: i32) -> (i32, i32) {
    %c0_i32 = arith.constant 0 : i32
    %c0_i32_0 = arith.constant 0 : i32
    return %arg0, %c0_i32 : i32, i32
  }
  func.func @transform_1(%arg0: i32) -> (i32, i32) {
    %c0_i32 = arith.constant 0 : i32
    %c0_i32_0 = arith.constant 0 : i32
    %c0_i32_1 = arith.constant 0 : i32
    return %c0_i32, %c0_i32_0 : i32, i32
  }
  func.func @transform_2(%arg0: i32) -> (i32, i32) {
    %c0_i32 = arith.constant 0 : i32
    %c0_i32_0 = arith.constant 0 : i32
    %c0_i32_1 = arith.constant 0 : i32
    return %c0_i32, %c0_i32_0 : i32, i32
  }
  func.func @transform_3(%arg0: i32) -> (i32, i32) {
    %c0_i32 = arith.constant 0 : i32
    %c0_i32_0 = arith.constant 0 : i32
    return %arg0, %c0_i32 : i32, i32
  }
}

</mosaic_0001>

<bundles_post_ra>
// kernel: tpu_custom_call.1
= control target key start
LH: loop header
LB: loop body
LE: loop exit
PB: predicated region body
PF: predicated region fallthrough
CT: control target
= control target key end

     0   :  { %vm264_vm0 = vcmask 15360   ;;  %s661_s1 = inlined_call_operand.vmem [shape: f32[768,2], index: 1, kind: input, shape index: {}]   ;;  %s662_s0 = inlined_call_operand.vmem [shape: f32[10,768], index: 0, kind: input, shape index: {}]   ;;  %s663_s2 = inlined_call_operand.vmem [shape: f32[1,2], index: 2, kind: input, shape index: {}]   ;;  %s664_s3 = inlined_call_operand.vmem [shape: f32[10,2], index: 3, kind: output, shape index: {}]  }
   0x1   :  { %v46_v0 = vld [vmem:[%s661_s1 + $0x70] sm:$0xff]  ;;  %v47_v1 = vld [vmem:[%s661_s1 + $0x78] sm:$0xff]  ;;  %v44_v9 = vld [vmem:[%s661_s1 + $0x60] sm:$0xff] }
   0x2   :  { %v62_v2 = vld [vmem:[%s661_s1 + $0xf0] sm:$0xff]  ;;  %v135_v3 = vpack.c.bf16 %v47_v1, %v46_v0  ;;  %v63_v4 = vld [vmem:[%s661_s1 + $0xf8] sm:$0xff]  ;;  %v45_v10 = vld [vmem:[%s661_s1 + $0x68] sm:$0xff] }
   0x3   :  { %v78_v5 = vld [vmem:[%s661_s1 + $0x170] sm:$0xff]  ;;  %v79_v6 = vld [vmem:[%s661_s1 + $0x178] sm:$0xff]  ;;  %v143_v7 = vpack.c.bf16 %v63_v4, %v62_v2  ;;  %v60_v11 = vld [vmem:[%s661_s1 + $0xe0] sm:$0xff]  ;;  %v134_v12 = vpack.c.bf16 %v45_v10, %v44_v9 }
   0x4   :  { %v151_v8 = vpack.c.bf16 %v79_v6, %v78_v5  ;;  %180 = vmatpush.bf16.msra.mxu0 %v135_v3  ;;  %v61_v13 = vld [vmem:[%s661_s1 + $0xe8] sm:$0xff]  ;;  %v94_v14 = vld [vmem:[%s661_s1 + $0x1f0] sm:$0xff]  ;;  %v95_v15 = vld [vmem:[%s661_s1 + $0x1f8] sm:$0xff] }
   0x5   :  { %194 = vmatpush.bf16.msra.mxu1 %v143_v7  ;;  %v142_v16 = vpack.c.bf16 %v61_v13, %v60_v11  ;;  %v159_v17 = vpack.c.bf16 %v95_v15, %v94_v14  ;;  %v76_v18 = vld [vmem:[%s661_s1 + $0x160] sm:$0xff]  ;;  %v77_v19 = vld [vmem:[%s661_s1 + $0x168] sm:$0xff]  ;;  %v42_v20 = vld [vmem:[%s661_s1 + $0x50] sm:$0xff] }
   0x6   :  { %208 = vmatpush.bf16.msra.mxu2 %v151_v8  ;;  %v150_v21 = vpack.c.bf16 %v77_v19, %v76_v18  ;;  %v43_v22 = vld [vmem:[%s661_s1 + $0x58] sm:$0xff]  ;;  %v58_v23 = vld [vmem:[%s661_s1 + $0xd0] sm:$0xff]  ;;  %v92_v25 = vld [vmem:[%s661_s1 + $0x1e0] sm:$0xff] }
   0x7   :  { %v59_v24 = vld [vmem:[%s661_s1 + $0xd8] sm:$0xff]  ;;  %222 = vmatpush.bf16.msra.mxu3 %v159_v17  ;;  %v93_v26 = vld [vmem:[%s661_s1 + $0x1e8] sm:$0xff]  ;;  %v74_v27 = vld [vmem:[%s661_s1 + $0x150] sm:$0xff]  ;;  %v133_v28 = vpack.c.bf16 %v43_v22, %v42_v20 }
   0x8   :  { %181 = vmatpush.bf16.msra.mxu0 %v134_v12  ;;  %v158_v29 = vpack.c.bf16 %v93_v26, %v92_v25  ;;  %v75_v30 = vld [vmem:[%s661_s1 + $0x158] sm:$0xff]  ;;  %v40_v31 = vld [vmem:[%s661_s1 + $0x40] sm:$0xff]  ;;  %v41_v32 = vld [vmem:[%s661_s1 + $0x48] sm:$0xff]  ;;  %v141_v33 = vpack.c.bf16 %v59_v24, %v58_v23 }
   0x9   :  { %195 = vmatpush.bf16.msra.mxu1 %v142_v16  ;;  %v149_v34 = vpack.c.bf16 %v75_v30, %v74_v27  ;;  %v56_v35 = vld [vmem:[%s661_s1 + $0xc0] sm:$0xff]  ;;  %v57_v36 = vld [vmem:[%s661_s1 + $0xc8] sm:$0xff]  ;;  %v90_v37 = vld [vmem:[%s661_s1 + $0x1d0] sm:$0xff]  ;;  %v132_v42 = vpack.c.bf16 %v41_v32, %v40_v31 }
   0xa   :  { %209 = vmatpush.bf16.msra.mxu2 %v150_v21  ;;  %v91_v38 = vld [vmem:[%s661_s1 + $0x1d8] sm:$0xff]  ;;  %v72_v39 = vld [vmem:[%s661_s1 + $0x140] sm:$0xff]  ;;  %v73_v40 = vld [vmem:[%s661_s1 + $0x148] sm:$0xff]  ;;  %v140_v45 = vpack.c.bf16 %v57_v36, %v56_v35 }
   0xb   :  { %223 = vmatpush.bf16.msra.mxu3 %v158_v29  ;;  %v157_v41 = vpack.c.bf16 %v91_v38, %v90_v37  ;;  %v88_v43 = vld [vmem:[%s661_s1 + $0x1c0] sm:$0xff]  ;;  %v89_v44 = vld [vmem:[%s661_s1 + $0x1c8] sm:$0xff]  ;;  %v148_v46 = vpack.c.bf16 %v73_v40, %v72_v39  ;;  %v38_v47 = vld [vmem:[%s661_s1 + $0x30] sm:$0xff] }
   0xc   :  { %182 = vmatpush.bf16.msra.mxu0 %v133_v28  ;;  %v39_v48 = vld [vmem:[%s661_s1 + $0x38] sm:$0xff]  ;;  %v54_v49 = vld [vmem:[%s661_s1 + $0xb0] sm:$0xff]  ;;  %v156_v53 = vpack.c.bf16 %v89_v44, %v88_v43  ;;  %v36_v59 = vld [vmem:[%s661_s1 + $0x20] sm:$0xff] }
   0xd   :  { %196 = vmatpush.bf16.msra.mxu1 %v141_v33  ;;  %v55_v50 = vld [vmem:[%s661_s1 + $0xb8] sm:$0xff]  ;;  %v70_v51 = vld [vmem:[%s661_s1 + $0x130] sm:$0xff]  ;;  %v131_v54 = vpack.c.bf16 %v39_v48, %v38_v47  ;;  %v37_v60 = vld [vmem:[%s661_s1 + $0x28] sm:$0xff] }
   0xe   :  { %210 = vmatpush.bf16.msra.mxu2 %v149_v34  ;;  %v71_v52 = vld [vmem:[%s661_s1 + $0x138] sm:$0xff]  ;;  %v86_v55 = vld [vmem:[%s661_s1 + $0x1b0] sm:$0xff]  ;;  %v139_v57 = vpack.c.bf16 %v55_v50, %v54_v49  ;;  %v52_v61 = vld [vmem:[%s661_s1 + $0xa0] sm:$0xff]  ;;  %v130_v2 = vpack.c.bf16 %v37_v60, %v36_v59 }
   0xf   :  { %224 = vmatpush.bf16.msra.mxu3 %v157_v41  ;;  %v87_v56 = vld [vmem:[%s661_s1 + $0x1b8] sm:$0xff]  ;;  %v147_v58 = vpack.c.bf16 %v71_v52, %v70_v51  ;;  %v53_v62 = vld [vmem:[%s661_s1 + $0xa8] sm:$0xff]  ;;  %v68_v63 = vld [vmem:[%s661_s1 + $0x120] sm:$0xff] }
  0x10   :  { %183 = vmatpush.bf16.msra.mxu0 %v132_v42  ;;  %v69_v0 = vld [vmem:[%s661_s1 + $0x128] sm:$0xff]  ;;  %v155_v1 = vpack.c.bf16 %v87_v56, %v86_v55  ;;  %v84_v3 = vld [vmem:[%s661_s1 + $0x1a0] sm:$0xff]  ;;  %v138_v5 = vpack.c.bf16 %v53_v62, %v52_v61  ;;  %v34_v7 = vld [vmem:[%s661_s1 + $0x10] sm:$0xff] }
  0x11   :  { %197 = vmatpush.bf16.msra.mxu1 %v140_v45  ;;  %v85_v4 = vld [vmem:[%s661_s1 + $0x1a8] sm:$0xff]  ;;  %v146_v6 = vpack.c.bf16 %v69_v0, %v68_v63  ;;  %v35_v8 = vld [vmem:[%s661_s1 + $0x18] sm:$0xff]  ;;  %v50_v9 = vld [vmem:[%s661_s1 + $0x90] sm:$0xff] }
  0x12   :  { %211 = vmatpush.bf16.msra.mxu2 %v148_v46  ;;  %v51_v10 = vld [vmem:[%s661_s1 + $0x98] sm:$0xff]  ;;  %v66_v11 = vld [vmem:[%s661_s1 + $0x110] sm:$0xff]  ;;  %v154_v13 = vpack.c.bf16 %v85_v4, %v84_v3  ;;  %v32_v14 = vld [vmem:[%s661_s1] sm:$0xff]  ;;  %v129_v16 = vpack.c.bf16 %v35_v8, %v34_v7 }
  0x13   :  { %225 = vmatpush.bf16.msra.mxu3 %v156_v53  ;;  %v67_v12 = vld [vmem:[%s661_s1 + $0x118] sm:$0xff]  ;;  %v33_v15 = vld [vmem:[%s661_s1 + $0x8] sm:$0xff]  ;;  %v48_v17 = vld [vmem:[%s661_s1 + $0x80] sm:$0xff]  ;;  %v137_v20 = vpack.c.bf16 %v51_v10, %v50_v9 }
  0x14   :  { %184 = vmatpush.bf16.msra.mxu0 %v131_v54  ;;  %v82_v18 = vld [vmem:[%s661_s1 + $0x190] sm:$0xff]  ;;  %v83_v19 = vld [vmem:[%s661_s1 + $0x198] sm:$0xff]  ;;  %v145_v21 = vpack.c.bf16 %v67_v12, %v66_v11  ;;  %v49_v22 = vld [vmem:[%s661_s1 + $0x88] sm:$0xff]  ;;  %v128_v32 = vpack.c.bf16 %v33_v15, %v32_v14 }
  0x15   :  { %198 = vmatpush.bf16.msra.mxu1 %v139_v57  ;;  %v110_v23 = vld [vmem:[%s661_s1 + $0x270] sm:$0xff]  ;;  %v111_v24 = vld [vmem:[%s661_s1 + $0x278] sm:$0xff]  ;;  %v64_v27 = vld [vmem:[%s661_s1 + $0x100] sm:$0xff]  ;;  %v153_v28 = vpack.c.bf16 %v83_v19, %v82_v18  ;;  %v136_v36 = vpack.c.bf16 %v49_v22, %v48_v17 }
  0x16   :  { %212 = vmatpush.bf16.msra.mxu2 %v147_v58  ;;  %v126_v25 = vld [vmem:[%s661_s1 + $0x2f0] sm:$0xff]  ;;  %v127_v26 = vld [vmem:[%s661_s1 + $0x2f8] sm:$0xff]  ;;  %v65_v29 = vld [vmem:[%s661_s1 + $0x108] sm:$0xff]  ;;  %v167_v37 = vpack.c.bf16 %v111_v24, %v110_v23 }
  0x17   :  { %226 = vmatpush.bf16.msra.mxu3 %v155_v1  ;;  %v80_v30 = vld [vmem:[%s661_s1 + $0x180] sm:$0xff]  ;;  %v81_v31 = vld [vmem:[%s661_s1 + $0x188] sm:$0xff]  ;;  %v20_v35 = vld [vmem:[%s662_s0 + $0x30] sm:$0xff]  ;;  %v175_v41 = vpack.c.bf16 %v127_v26, %v126_v25  ;;  %v144_v42 = vpack.c.bf16 %v65_v29, %v64_v27 }
  0x18   :  { %185 = vmatpush.bf16.msra.mxu0 %v130_v2  ;;  %v108_v33 = vld [vmem:[%s661_s1 + $0x260] sm:$0xff]  ;;  %v109_v38 = vld [vmem:[%s661_s1 + $0x268] sm:$0xff]  ;;  %v21_v40 = vld [vmem:[%s662_s0 + $0x38] sm:$0xff]  ;;  %v152_v46 = vpack.c.bf16 %v81_v31, %v80_v30 }
  0x19   :  { %199 = vmatpush.bf16.msra.mxu1 %v138_v5  ;;  %v14_v34 = vld [vmem:[%s662_s0] sm:$0xff]  ;;  %v15_v39 = vld [vmem:[%s662_s0 + $0x8] sm:$0xff]  ;;  %v16_v44 = vld [vmem:[%s662_s0 + $0x10] sm:$0xff]  ;;  %v166_v52 = vpack.c.bf16 %v109_v38, %v108_v33 }
  0x1a   :  { %213 = vmatpush.bf16.msra.mxu2 %v146_v6  ;;  %v124_v43 = vld [vmem:[%s661_s1 + $0x2e0] sm:$0xff]  ;;  %v125_v47 = vld [vmem:[%s661_s1 + $0x2e8] sm:$0xff]  ;;  %v26_v48 = vpack.c.bf16 %v20_v35, %v14_v34  ;;  %v17_v49 = vld [vmem:[%s662_s0 + $0x18] sm:$0xff]  ;;  %v27_v51 = vpack.c.bf16 %v21_v40, %v15_v39 }
  0x1b   :  { %227 = vmatpush.bf16.msra.mxu3 %v154_v13  ;;  %v22_v45 = vld [vmem:[%s662_s0 + $0x40] sm:$0xff]  ;;  %v23_v50 = vld [vmem:[%s662_s0 + $0x48] sm:$0xff]  ;;  %v174_v54 = vpack.c.bf16 %v125_v47, %v124_v43  ;;  %v106_v56 = vld [vmem:[%s661_s1 + $0x250] sm:$0xff] }
  0x1c   :  { %186 = vmatpush.bf16.msra.mxu0 %v129_v16  ;;  %v28_v53 = vpack.c.bf16 %v22_v45, %v16_v44  ;;  %v29_v55 = vpack.c.bf16 %v23_v50, %v17_v49  ;;  %v107_v57 = vld [vmem:[%s661_s1 + $0x258] sm:$0xff]  ;;  %v122_v58 = vld [vmem:[%s661_s1 + $0x2d0] sm:$0xff]  ;;  %v104_v62 = vld [vmem:[%s661_s1 + $0x240] sm:$0xff] }
  0x1d   :  { %200 = vmatpush.bf16.msra.mxu1 %v137_v20  ;;  %v123_v59 = vld [vmem:[%s661_s1 + $0x2d8] sm:$0xff]  ;;  %v165_v60 = vpack.c.bf16 %v107_v57, %v106_v56  ;;  %v105_v63 = vld [vmem:[%s661_s1 + $0x248] sm:$0xff]  ;;  %v120_v0 = vld [vmem:[%s661_s1 + $0x2c0] sm:$0xff] }
  0x1e   :  { %214 = vmatpush.bf16.msra.mxu2 %v145_v21  ;;  %v173_v61 = vpack.c.bf16 %v123_v59, %v122_v58  ;;  %v121_v1 = vld [vmem:[%s661_s1 + $0x2c8] sm:$0xff]  ;;  %v164_v2 = vpack.c.bf16 %v105_v63, %v104_v62  ;;  %v102_v4 = vld [vmem:[%s661_s1 + $0x230] sm:$0xff]  ;;  %v103_v5 = vld [vmem:[%s661_s1 + $0x238] sm:$0xff] }
  0x1f   :  { %228 = vmatpush.bf16.msra.mxu3 %v153_v28  ;;  %v172_v3 = vpack.c.bf16 %v121_v1, %v120_v0  ;;  %v118_v6 = vld [vmem:[%s661_s1 + $0x2b0] sm:$0xff]  ;;  %v119_v7 = vld [vmem:[%s661_s1 + $0x2b8] sm:$0xff]  ;;  %v163_v8 = vpack.c.bf16 %v103_v5, %v102_v4  ;;  %v100_v10 = vld [vmem:[%s661_s1 + $0x220] sm:$0xff] }
  0x20   :  { %187 = vmatpush.bf16.msra.mxu0 %v128_v32  ;;  %v171_v9 = vpack.c.bf16 %v119_v7, %v118_v6  ;;  %v101_v11 = vld [vmem:[%s661_s1 + $0x228] sm:$0xff]  ;;  %v116_v12 = vld [vmem:[%s661_s1 + $0x2a0] sm:$0xff]  ;;  %v98_v16 = vld [vmem:[%s661_s1 + $0x210] sm:$0xff] }
  0x21   :  { %201 = vmatpush.bf16.msra.mxu1 %v136_v36  ;;  %v117_v13 = vld [vmem:[%s661_s1 + $0x2a8] sm:$0xff]  ;;  %v162_v14 = vpack.c.bf16 %v101_v11, %v100_v10  ;;  %v99_v17 = vld [vmem:[%s661_s1 + $0x218] sm:$0xff]  ;;  %v114_v18 = vld [vmem:[%s661_s1 + $0x290] sm:$0xff] }
  0x22   :  { %215 = vmatpush.bf16.msra.mxu2 %v144_v42  ;;  %v170_v15 = vpack.c.bf16 %v117_v13, %v116_v12  ;;  %v115_v19 = vld [vmem:[%s661_s1 + $0x298] sm:$0xff]  ;;  %v161_v20 = vpack.c.bf16 %v99_v17, %v98_v16  ;;  %v96_v22 = vld [vmem:[%s661_s1 + $0x200] sm:$0xff]  ;;  %v97_v23 = vld [vmem:[%s661_s1 + $0x208] sm:$0xff] }
  0x23   :  { %229 = vmatpush.bf16.msra.mxu3 %v152_v46  ;;  %188 = vmatmul.bf16.vlgmr.msra.gmra.mxu0 %v26_v48  ;;  %v169_v21 = vpack.c.bf16 %v115_v19, %v114_v18  ;;  %v112_v24 = vld [vmem:[%s661_s1 + $0x280] sm:$0xff]  ;;  %v113_v25 = vld [vmem:[%s661_s1 + $0x288] sm:$0xff]  ;;  %v160_v26 = vpack.c.bf16 %v97_v23, %v96_v22  ;;  %v24_v28 = vld [vmem:[%s662_s0 + $0x50] sm:$0xff] }
  0x24   :  { %236 = vmatpush.bf16.msrb.mxu0 %v167_v37  ;;  %202 = vmatmul.bf16.vlgmr.msra.gmra.mxu1 %v27_v51  ;;  %v18_v27 = vld [vmem:[%s662_s0 + $0x20] sm:$0xff]  ;;  %v168_v29 = vpack.c.bf16 %v113_v25, %v112_v24  ;;  %v19_v30 = vld [vmem:[%s662_s0 + $0x28] sm:$0xff]  ;;  %v25_v31 = vld [vmem:[%s662_s0 + $0x58] sm:$0xff] }
  0x25   :  { %250 = vmatpush.bf16.msrb.mxu1 %v175_v41  ;;  %216 = vmatmul.bf16.vlgmr.msra.gmra.mxu2 %v28_v53  ;;  %v30_v32 = vpack.c.bf16 %v24_v28, %v18_v27  ;;  %v31_v33 = vpack.c.bf16 %v25_v31, %v19_v30  ;;  %v293_v35 = vld [vmem:[%s663_s2] ss:$0 sm:$0xff] }
  0x26   :  { %230 = vmatmul.bf16.vlgmr.msra.gmra.mxu3 %v29_v55 }
  0x28   :  { %237 = vmatpush.bf16.msrb.mxu0 %v166_v52 }
  0x29   :  { %251 = vmatpush.bf16.msrb.mxu1 %v174_v54 }
  0x2c   :  { %238 = vmatpush.bf16.msrb.mxu0 %v165_v60 }
  0x2d   :  { %252 = vmatpush.bf16.msrb.mxu1 %v173_v61 }
  0x30   :  { %239 = vmatpush.bf16.msrb.mxu0 %v164_v2 }
  0x31   :  { %253 = vmatpush.bf16.msrb.mxu1 %v172_v3 }
  0x34   :  { %240 = vmatpush.bf16.msrb.mxu0 %v163_v8 }
  0x35   :  { %254 = vmatpush.bf16.msrb.mxu1 %v171_v9 }
  0x38   :  { %241 = vmatpush.bf16.msrb.mxu0 %v162_v14 }
  0x39   :  { %255 = vmatpush.bf16.msrb.mxu1 %v170_v15 }
  0x3c   :  { %242 = vmatpush.bf16.msrb.mxu0 %v161_v20 }
  0x3d   :  { %256 = vmatpush.bf16.msrb.mxu1 %v169_v21 }
  0x40   :  { %243 = vmatpush.bf16.msrb.mxu0 %v160_v26 }
  0x41   :  { %257 = vmatpush.bf16.msrb.mxu1 %v168_v29 }
  0x43   :  { %244 = vmatmul.bf16.vlgmr.msrb.gmra.mxu0 %v30_v32 }
  0x44   :  { %258 = vmatmul.bf16.vlgmr.msrb.gmra.mxu1 %v31_v33 }
  0xa0   :  { %v189_v34 = vpop.f32.mrf.mxu0 }
  0xa1   :  { %v203_v36 = vpop.f32.mrf.mxu1  ;;  %v190_v37 = vadd.f32 %v293_v35, %v189_v34 }
  0xa3   :  { %v204_v39 = vadd.f32 %v203_v36, %v190_v37 }
  0xa8   :  { %v217_v38 = vpop.f32.mrf.mxu2  ;;  %v191_v40 = vpop.f32.mrf.mxu0 }
  0xa9   :  { %v205_v41 = vpop.f32.mrf.mxu1  ;;  %v231_v42 = vpop.f32.mrf.mxu3  ;;  %v218_v43 = vadd.f32 %v217_v38, %v204_v39  ;;  %v192_v44 = vadd.f32 %v293_v35, %v191_v40 }
  0xab   :  { %v232_v45 = vadd.f32 %v231_v42, %v218_v43  ;;  %v206_v46 = vadd.f32 %v205_v41, %v192_v44 }
  0xb0   :  { %v219_v47 = vpop.f32.mrf.mxu2 }
  0xb1   :  { %v220_v51 = vadd.f32 %v219_v47, %v206_v46  ;;  %v233_v53 = vpop.f32.mrf.mxu3 }
  0xb3   :  { %v234_v55 = vadd.f32 %v233_v53, %v220_v51 }
  0xc0   :  { %v245_v48 = vpop.f32.mrf.mxu0 }
  0xc1   :  { %v246_v49 = vadd.f32 %v245_v48, %v232_v45  ;;  %v259_v50 = vpop.f32.mrf.mxu1 }
  0xc3   :  { %v260_v52 = vadd.f32 %v259_v50, %v246_v49 }
  0xc5   :  { %v265_v54 = vsel %vm264_vm0, %v260_v52, -inf }
  0xc6   :  { %266 = vmax.xlane.f32.xlu0 %v265_v54 }
  0xc8   :  { %v247_v56 = vpop.f32.mrf.mxu0 }
  0xc9   :  { %v248_v57 = vadd.f32 %v247_v56, %v234_v55  ;;  %v261_v58 = vpop.f32.mrf.mxu1 }
  0xcb   :  { %v262_v59 = vadd.f32 %v261_v58, %v248_v57 }
  0xcd   :  { %v268_v60 = vsel %vm264_vm0, %v262_v59, -inf }
  0xce   :  { %269 = vmax.xlane.f32.xlu0 %v268_v60 }
 0x139   :  { %v267_v61 = vpop.xlane.xlu0 %266 }
 0x13a   :  { %v271_v62 = vsub.f32 %v260_v52, %v267_v61 }
 0x13c   :  { %v273_v63 = vmul.f32 1.442695, %v271_v62 }
 0x13e   :  { %294 = vpow2.f32 %v273_v63 }
 0x141   :  { %v270_v0 = vpop.xlane.xlu0 %269 }
 0x142   :  { %v272_v1 = vsub.f32 %v262_v59, %v270_v0 }
 0x144   :  { %v295_v2 = vpop.eup %294  ;;  %v275_v3 = vmul.f32 1.442695, %v272_v1 }
 0x145   :  { %v277_v4 = vsel %vm264_vm0, %v295_v2, 0.0 }
 0x146   :  { %296 = vpow2.f32 %v275_v3  ;;  %278 = vadd.xlane.f32.xlu1 %v277_v4 }
 0x14c   :  { %v297_v5 = vpop.eup %296 }
 0x14d   :  { %v280_v6 = vsel %vm264_vm0, %v297_v5, 0.0 }
 0x14e   :  { %281 = vadd.xlane.f32.xlu1 %v280_v6 }
 0x1b9   :  { %v279_v7 = vpop.xlane.xlu1 %278 }
 0x1ba   :  { %298 = vrcp.f32 %v279_v7 }
 0x1c0   :  { %v299_v8 = vpop.eup %298 }
 0x1c1   :  { %v285_v9 = vmul.f32 %v299_v8, %v295_v2  ;;  %v282_v10 = vpop.xlane.xlu1 %281 }
 0x1c2   :  { %300 = vrcp.f32 %v282_v10 }
 0x1c3   :  { %287 = vst.msk [vmem:[%s664_s3] sm:$0xff] %vm264_vm0, %v285_v9 }
 0x1c8   :  { %v301_v11 = vpop.eup %300 }
 0x1c9   :  { %v286_v12 = vmul.f32 %v301_v11, %v297_v5 }
 0x1cb   :  { %288 = vst.msk [vmem:[%s664_s3 + $0x8] sm:$0xff] %vm264_vm0, %v286_v12 }

</bundles_post_ra>
